<compile_context>
chip_gen: v5e
topology: v5e:2x2
jax: 0.10.0
libtpu: 0.0.40
codegen_flags: <defaults>
</compile_context>

<pallas_src>
import functools
import numpy as np
import jax
import jax.numpy as jnp
from jax import lax
from jax.experimental import pallas as pl
from jax.experimental.pallas import tpu as pltpu


_TILE_R = 256      # sublane rows per grid block  (256 x 512 = 128K edges/step)
_CHUNK_R = 8       # rows per in-kernel sub-chunk (bounds vreg pressure)
_LANES = 512       # lane-dense minor dim (multiple of 128)
_BLOCK = _TILE_R * _LANES


def _node_dropout_mask_kernel(drop_u_ref, drop_i_ref, eu_ref, ei_ref, mask_ref):
    """drop_u_ref / drop_i_ref: SMEM (Du,), (Di,) int32 drop ids (scalar
       prefetch), each padded to a multiple of 8 with -1 sentinels.
       eu_ref / ei_ref: VMEM (_TILE_R, _LANES) int32 edge endpoint ids.
       mask_ref:        VMEM (_TILE_R, _LANES) int8 keep-mask output."""
    n_u8 = drop_u_ref.shape[0] // 8          # static at trace time
    n_i8 = drop_i_ref.shape[0] // 8
    n_chunks = _TILE_R // _CHUNK_R

    # Fully unroll short drop scans; larger ones keep a visible fori_loop whose
    # body already carries 8 independent compare/OR chains (partial unroll).
    unroll_u = n_u8 <= 16
    unroll_i = n_i8 <= 16

    def scan_hits(ids_ref, n8, edges, unroll):
        def body(d, hit):
            base = d * 8
            for t in range(8):               # 8 compares per body
                hit = jnp.logical_or(hit, edges == ids_ref[base + t])
            return hit
        return lax.fori_loop(0, n8, body,
                             jnp.zeros(edges.shape, dtype=jnp.bool_),
                             unroll=unroll)

    @pl.loop(0, n_chunks)
    def _(c):
        r0 = pl.multiple_of(c * _CHUNK_R, _CHUNK_R)
        # User phase: only eu / hit_u live.
        eu = eu_ref[pl.ds(r0, _CHUNK_R), :]
        hit_u = scan_hits(drop_u_ref, n_u8, eu, unroll_u)
        # Item phase: eu / hit_u dead -> low vreg pressure.
        ei = ei_ref[pl.ds(r0, _CHUNK_R), :]
        hit_i = scan_hits(drop_i_ref, n_i8, ei, unroll_i)
        # keep edge iff NOT (user dropped AND item dropped)   (De Morgan)
        keep = jnp.logical_not(jnp.logical_and(hit_u, hit_i))
        mask_ref[pl.ds(r0, _CHUNK_R), :] = keep.astype(jnp.int8)


@functools.partial(jax.jit, static_argnames=("num_edges",))
def _node_dropout_mask(eu2d, ei2d, drop_u, drop_i, *, num_edges):
    """Boolean keep-mask of shape (num_edges,), computed on TPU via Pallas."""
    rows, lanes = eu2d.shape
    grid = (rows // _TILE_R,)
    mask2d = pl.pallas_call(
        _node_dropout_mask_kernel,
        out_shape=jax.ShapeDtypeStruct((rows, lanes), jnp.int8),
        grid_spec=pltpu.PrefetchScalarGridSpec(
            num_scalar_prefetch=2,            # drop_u, drop_i -> SMEM
            grid=grid,
            in_specs=[
                pl.BlockSpec((_TILE_R, _LANES), lambda i, du, di: (i, 0)),  # eu
                pl.BlockSpec((_TILE_R, _LANES), lambda i, du, di: (i, 0)),  # ei
            ],
            out_specs=pl.BlockSpec((_TILE_R, _LANES), lambda i, du, di: (i, 0)),
        ),
        compiler_params=pltpu.CompilerParams(
            dimension_semantics=("parallel",)),
    )(drop_u, drop_i, eu2d, ei2d)
    return mask2d.reshape(rows * lanes)[:num_edges].astype(jnp.bool_)


def _pad_drop_ids(ids):
    """Pad a (possibly empty) 1D int array of drop ids to a multiple of 8
    (minimum 8) with the -1 sentinel (never matches a real id >= 0, nor the
    -2 edge padding)."""
    n = int(ids.shape[0])
    n_pad = max(((n + 7) // 8) * 8, 8)
    out = np.full((n_pad,), -1, dtype=np.int32)
    if n:
        out[:n] = ids
    return out


class NodeDropout:
    """JAX/Pallas port of external/models/ngcf/NodeDropout.py."""

    def __init__(self, node_dropout, num_users, num_items):
        self.node_dropout = node_dropout
        self.num_users = num_users
        self.num_items = num_items
        self.all_nodes_indices = jnp.arange(0, num_users + num_items,
                                            dtype=jnp.int32)
        # Cached lane-dense staging of edge_index (re-used across calls; the
        # NGCF graph is fixed per epoch, so the pad/reshape copy happens once).
        self._staged_edges = None
        self._staged_key = None

    def _stage(self, edge_index):
        if self._staged_key is not edge_index:
            E = int(edge_index.shape[1])
            E_pad = ((E + _BLOCK - 1) // _BLOCK) * _BLOCK
            pad = E_pad - E
            rows = E_pad // _LANES
            eu = jnp.pad(edge_index[0].astype(jnp.int32), (0, pad),
                         constant_values=-2).reshape(rows, _LANES)
            ei = jnp.pad(edge_index[1].astype(jnp.int32), (0, pad),
                         constant_values=-2).reshape(rows, _LANES)
            self._staged_edges = (jax.device_put(eu), jax.device_put(ei), E)
            self._staged_key = edge_index
        return self._staged_edges

    def __call__(self, edge_index, key):
        if self.node_dropout:
            n_total = self.num_users + self.num_items
            n_drop = int(round(n_total * self.node_dropout))
            perm = jax.random.permutation(key, n_total)
            nodes_to_drop = self.all_nodes_indices[perm][:n_drop]

            eu2d, ei2d, E = self._stage(edge_index)

            if n_drop == 0:
                keep_mask = np.ones((E,), dtype=bool)
            else:
                # Split by endpoint side: a drop id can only ever match the
                # endpoint it belongs to (user ids < num_users, items >=).
                nodes_np = np.asarray(nodes_to_drop)
                users_drop = nodes_np[nodes_np < self.num_users].astype(np.int32)
                items_drop = nodes_np[nodes_np >= self.num_users].astype(np.int32)
                drop_u = jnp.asarray(_pad_drop_ids(users_drop))
                drop_i = jnp.asarray(_pad_drop_ids(items_drop))
                keep_mask = np.asarray(
                    _node_dropout_mask(eu2d, ei2d, drop_u, drop_i, num_edges=E))

            # TODO(synk): dynamic-shape boolean compaction has no static-shape
            # Pallas equivalent; done eagerly on host from the kernel's mask.
            ei_np = np.asarray(edge_index)
            dropout_users = ei_np[0, keep_mask][None, :]
            dropout_items = ei_np[1, keep_mask][None, :]
            return jnp.asarray(
                np.concatenate([dropout_users, dropout_items], axis=0)), \
                keep_mask, nodes_to_drop
        else:
            return edge_index, None, None


if __name__ == "__main__":
    num_users, num_items = 12, 20
    node_dropout = 0.25
    E = 300

    key = jax.random.PRNGKey(0)
    k_u, k_i, k_perm = jax.random.split(key, 3)

    users_row = jax.random.randint(k_u, (E,), 0, num_users, dtype=jnp.int32)
    items_row = jax.random.randint(k_i, (E,), num_users,
                                   num_users + num_items, dtype=jnp.int32)
    edge_index = jnp.stack([users_row, items_row], axis=0)   # [2, E] int32

    module = NodeDropout(node_dropout, num_users, num_items)
    out, keep_mask, nodes_to_drop = module(edge_index, k_perm)
    out = jax.block_until_ready(out)

    # ---- reference check (mirrors the torch/numpy logic exactly) ----
    nodes_np = np.asarray(nodes_to_drop)
    users_drop_np = nodes_np[nodes_np < num_users]
    items_drop_np = nodes_np[nodes_np >= num_users]
    ei_np = np.asarray(edge_index)
    mask_users = np.invert(np.isin(ei_np[0], users_drop_np))
    mask_items = np.invert(np.isin(ei_np[1], items_drop_np))
    mask_ref = mask_users + mask_items                        # logical OR
    ref_out = np.concatenate([ei_np[0, mask_ref][None, :],
                              ei_np[1, mask_ref][None, :]], axis=0)

    assert np.array_equal(np.asarray(keep_mask), mask_ref), "mask mismatch"
    assert out.shape == ref_out.shape, (out.shape, ref_out.shape)
    assert np.array_equal(np.asarray(out), ref_out), "output mismatch"

    print("KERNEL_OK")
</pallas_src>

<mosaic_0001>
module attributes {stable_mosaic.version = 11 : i64} {
  func.func @_node_dropout_mask_kernel(%arg0: i32, %arg1: memref<8xi32, #tpu.memory_space<smem>>, %arg2: memref<8xi32, #tpu.memory_space<smem>>, %arg3: memref<256x512xi32, #tpu.memory_space<vmem>>, %arg4: memref<256x512xi32, #tpu.memory_space<vmem>>, %arg5: memref<256x512xi8, #tpu.memory_space<vmem>>) attributes {dimension_semantics = [#tpu.dimension_semantics<parallel>], iteration_bounds = array<i64: 1>, scalar_prefetch = 2 : i64, scratch_operands = 0 : i64, tpu.core_type = #tpu.core_type<tc>, window_params = [{transform_indices = @transform_0, window_bounds = array<i64: 256, 512>}, {transform_indices = @transform_1, window_bounds = array<i64: 256, 512>}, {transform_indices = @transform_2, window_bounds = array<i64: 256, 512>}]} {
    %c0_i32 = arith.constant 0 : i32
    %c32_i32 = arith.constant 32 : i32
    %0 = arith.addi %c0_i32, %c32_i32 : i32
    %c1_i32 = arith.constant 1 : i32
    scf.for %arg6 = %c0_i32 to %0 step %c1_i32  : i32 {
      %c1_i32_1 = arith.constant 1 : i32
      %1 = arith.muli %arg6, %c1_i32_1 : i32
      %c0_i32_2 = arith.constant 0 : i32
      %2 = arith.addi %c0_i32_2, %1 : i32
      %c8_i32 = arith.constant 8 : i32
      %3 = arith.muli %2, %c8_i32 : i32
      %4 = tpu.assume_multiple %3, 8 : i32
      %5 = arith.index_cast %4 : i32 to index
      %c0 = arith.constant 0 : index
      %6 = vector.load %arg3[%5, %c0] : memref<256x512xi32, #tpu.memory_space<vmem>>, vector<8x512xi32>
      %false = arith.constant false
      %7 = vector.broadcast %false : i1 to vector<8x512xi1>
      %c0_i32_3 = arith.constant 0 : i32
      %c8_i32_4 = arith.constant 8 : i32
      %8 = arith.muli %c0_i32_3, %c8_i32_4 : i32
      %c0_i32_5 = arith.constant 0 : i32
      %9 = arith.addi %8, %c0_i32_5 : i32
      %10 = arith.index_cast %9 : i32 to index
      %11 = memref.load %arg1[%10] : memref<8xi32, #tpu.memory_space<smem>>
      %12 = vector.broadcast %11 : i32 to vector<8x512xi32>
      %13 = arith.cmpi eq, %6, %12 : vector<8x512xi32>
      %14 = arith.ori %7, %13 : vector<8x512xi1>
      %c1_i32_6 = arith.constant 1 : i32
      %15 = arith.addi %8, %c1_i32_6 : i32
      %16 = arith.index_cast %15 : i32 to index
      %17 = memref.load %arg1[%16] : memref<8xi32, #tpu.memory_space<smem>>
      %18 = vector.broadcast %17 : i32 to vector<8x512xi32>
      %19 = arith.cmpi eq, %6, %18 : vector<8x512xi32>
      %20 = arith.ori %14, %19 : vector<8x512xi1>
      %c2_i32 = arith.constant 2 : i32
      %21 = arith.addi %8, %c2_i32 : i32
      %22 = arith.index_cast %21 : i32 to index
      %23 = memref.load %arg1[%22] : memref<8xi32, #tpu.memory_space<smem>>
      %24 = vector.broadcast %23 : i32 to vector<8x512xi32>
      %25 = arith.cmpi eq, %6, %24 : vector<8x512xi32>
      %26 = arith.ori %20, %25 : vector<8x512xi1>
      %c3_i32 = arith.constant 3 : i32
      %27 = arith.addi %8, %c3_i32 : i32
      %28 = arith.index_cast %27 : i32 to index
      %29 = memref.load %arg1[%28] : memref<8xi32, #tpu.memory_space<smem>>
      %30 = vector.broadcast %29 : i32 to vector<8x512xi32>
      %31 = arith.cmpi eq, %6, %30 : vector<8x512xi32>
      %32 = arith.ori %26, %31 : vector<8x512xi1>
      %c4_i32 = arith.constant 4 : i32
      %33 = arith.addi %8, %c4_i32 : i32
      %34 = arith.index_cast %33 : i32 to index
      %35 = memref.load %arg1[%34] : memref<8xi32, #tpu.memory_space<smem>>
      %36 = vector.broadcast %35 : i32 to vector<8x512xi32>
      %37 = arith.cmpi eq, %6, %36 : vector<8x512xi32>
      %38 = arith.ori %32, %37 : vector<8x512xi1>
      %c5_i32 = arith.constant 5 : i32
      %39 = arith.addi %8, %c5_i32 : i32
      %40 = arith.index_cast %39 : i32 to index
      %41 = memref.load %arg1[%40] : memref<8xi32, #tpu.memory_space<smem>>
      %42 = vector.broadcast %41 : i32 to vector<8x512xi32>
      %43 = arith.cmpi eq, %6, %42 : vector<8x512xi32>
      %44 = arith.ori %38, %43 : vector<8x512xi1>
      %c6_i32 = arith.constant 6 : i32
      %45 = arith.addi %8, %c6_i32 : i32
      %46 = arith.index_cast %45 : i32 to index
      %47 = memref.load %arg1[%46] : memref<8xi32, #tpu.memory_space<smem>>
      %48 = vector.broadcast %47 : i32 to vector<8x512xi32>
      %49 = arith.cmpi eq, %6, %48 : vector<8x512xi32>
      %50 = arith.ori %44, %49 : vector<8x512xi1>
      %c7_i32 = arith.constant 7 : i32
      %51 = arith.addi %8, %c7_i32 : i32
      %52 = arith.index_cast %51 : i32 to index
      %53 = memref.load %arg1[%52] : memref<8xi32, #tpu.memory_space<smem>>
      %54 = vector.broadcast %53 : i32 to vector<8x512xi32>
      %55 = arith.cmpi eq, %6, %54 : vector<8x512xi32>
      %56 = arith.ori %50, %55 : vector<8x512xi1>
      %c1_i32_7 = arith.constant 1 : i32
      %57 = arith.index_cast %4 : i32 to index
      %c0_8 = arith.constant 0 : index
      %58 = vector.load %arg4[%57, %c0_8] : memref<256x512xi32, #tpu.memory_space<vmem>>, vector<8x512xi32>
      %false_9 = arith.constant false
      %59 = vector.broadcast %false_9 : i1 to vector<8x512xi1>
      %c0_i32_10 = arith.constant 0 : i32
      %c8_i32_11 = arith.constant 8 : i32
      %60 = arith.muli %c0_i32_10, %c8_i32_11 : i32
      %c0_i32_12 = arith.constant 0 : i32
      %61 = arith.addi %60, %c0_i32_12 : i32
      %62 = arith.index_cast %61 : i32 to index
      %63 = memref.load %arg2[%62] : memref<8xi32, #tpu.memory_space<smem>>
      %64 = vector.broadcast %63 : i32 to vector<8x512xi32>
      %65 = arith.cmpi eq, %58, %64 : vector<8x512xi32>
      %66 = arith.ori %59, %65 : vector<8x512xi1>
      %c1_i32_13 = arith.constant 1 : i32
      %67 = arith.addi %60, %c1_i32_13 : i32
      %68 = arith.index_cast %67 : i32 to index
      %69 = memref.load %arg2[%68] : memref<8xi32, #tpu.memory_space<smem>>
      %70 = vector.broadcast %69 : i32 to vector<8x512xi32>
      %71 = arith.cmpi eq, %58, %70 : vector<8x512xi32>
      %72 = arith.ori %66, %71 : vector<8x512xi1>
      %c2_i32_14 = arith.constant 2 : i32
      %73 = arith.addi %60, %c2_i32_14 : i32
      %74 = arith.index_cast %73 : i32 to index
      %75 = memref.load %arg2[%74] : memref<8xi32, #tpu.memory_space<smem>>
      %76 = vector.broadcast %75 : i32 to vector<8x512xi32>
      %77 = arith.cmpi eq, %58, %76 : vector<8x512xi32>
      %78 = arith.ori %72, %77 : vector<8x512xi1>
      %c3_i32_15 = arith.constant 3 : i32
      %79 = arith.addi %60, %c3_i32_15 : i32
      %80 = arith.index_cast %79 : i32 to index
      %81 = memref.load %arg2[%80] : memref<8xi32, #tpu.memory_space<smem>>
      %82 = vector.broadcast %81 : i32 to vector<8x512xi32>
      %83 = arith.cmpi eq, %58, %82 : vector<8x512xi32>
      %84 = arith.ori %78, %83 : vector<8x512xi1>
      %c4_i32_16 = arith.constant 4 : i32
      %85 = arith.addi %60, %c4_i32_16 : i32
      %86 = arith.index_cast %85 : i32 to index
      %87 = memref.load %arg2[%86] : memref<8xi32, #tpu.memory_space<smem>>
      %88 = vector.broadcast %87 : i32 to vector<8x512xi32>
      %89 = arith.cmpi eq, %58, %88 : vector<8x512xi32>
      %90 = arith.ori %84, %89 : vector<8x512xi1>
      %c5_i32_17 = arith.constant 5 : i32
      %91 = arith.addi %60, %c5_i32_17 : i32
      %92 = arith.index_cast %91 : i32 to index
      %93 = memref.load %arg2[%92] : memref<8xi32, #tpu.memory_space<smem>>
      %94 = vector.broadcast %93 : i32 to vector<8x512xi32>
      %95 = arith.cmpi eq, %58, %94 : vector<8x512xi32>
      %96 = arith.ori %90, %95 : vector<8x512xi1>
      %c6_i32_18 = arith.constant 6 : i32
      %97 = arith.addi %60, %c6_i32_18 : i32
      %98 = arith.index_cast %97 : i32 to index
      %99 = memref.load %arg2[%98] : memref<8xi32, #tpu.memory_space<smem>>
      %100 = vector.broadcast %99 : i32 to vector<8x512xi32>
      %101 = arith.cmpi eq, %58, %100 : vector<8x512xi32>
      %102 = arith.ori %96, %101 : vector<8x512xi1>
      %c7_i32_19 = arith.constant 7 : i32
      %103 = arith.addi %60, %c7_i32_19 : i32
      %104 = arith.index_cast %103 : i32 to index
      %105 = memref.load %arg2[%104] : memref<8xi32, #tpu.memory_space<smem>>
      %106 = vector.broadcast %105 : i32 to vector<8x512xi32>
      %107 = arith.cmpi eq, %58, %106 : vector<8x512xi32>
      %108 = arith.ori %102, %107 : vector<8x512xi1>
      %c1_i32_20 = arith.constant 1 : i32
      %109 = arith.andi %56, %108 : vector<8x512xi1>
      %cst = arith.constant dense<true> : vector<8x512xi1>
      %110 = arith.xori %109, %cst : vector<8x512xi1>
      %111 = arith.extui %110 : vector<8x512xi1> to vector<8x512xi8>
      %112 = arith.index_cast %4 : i32 to index
      %c0_21 = arith.constant 0 : index
      %113 = vector.load %arg5[%112, %c0_21] : memref<256x512xi8, #tpu.memory_space<vmem>>, vector<8x512xi8>
      tpu.vector_store %arg5[%112, %c0_21], %111 {strides = array<i32>} : memref<256x512xi8, #tpu.memory_space<vmem>>, vector<8x512xi8>,
    }
    %c32_i32_0 = arith.constant 32 : i32
    return
  }
  func.func @transform_0(%arg0: i32, %arg1: memref<8xi32, #tpu.memory_space<smem>>, %arg2: memref<8xi32, #tpu.memory_space<smem>>) -> (i32, i32) {
    %c0_i32 = arith.constant 0 : i32
    %c0_i32_0 = arith.constant 0 : i32
    return %arg0, %c0_i32 : i32, i32
  }
  func.func @transform_1(%arg0: i32, %arg1: memref<8xi32, #tpu.memory_space<smem>>, %arg2: memref<8xi32, #tpu.memory_space<smem>>) -> (i32, i32) {
    %c0_i32 = arith.constant 0 : i32
    %c0_i32_0 = arith.constant 0 : i32
    return %arg0, %c0_i32 : i32, i32
  }
  func.func @transform_2(%arg0: i32, %arg1: memref<8xi32, #tpu.memory_space<smem>>, %arg2: memref<8xi32, #tpu.memory_space<smem>>) -> (i32, i32) {
    %c0_i32 = arith.constant 0 : i32
    %c0_i32_0 = arith.constant 0 : i32
    return %arg0, %c0_i32 : i32, i32
  }
}

</mosaic_0001>

<bundles_post_ra>
// kernel: _node_dropout_mask.1
= control target key start
LH: loop header
LB: loop body
LE: loop exit
PB: predicated region body
PF: predicated region fallthrough
CT: control target
= control target key end

     0   :  { %s417_s21 = smov [#allocation3]   ;;  %s418_s22 = smov [#allocation4]   ;;  %s685_s0 = inlined_call_operand.vmem [shape: s32[8], index: 0, kind: input, shape index: {}]   ;;  %s686_s2 = inlined_call_operand.hbm [shape: s32[256,512], index: 2, kind: input, shape index: {}]   ;;  %s687_s3 = inlined_call_operand.hbm [shape: s32[256,512], index: 3, kind: input, shape index: {}]   ;;  %s688_s4 = inlined_call_operand.vmem [shape: s8[256,512], index: 4, kind: output, shape index: {}]   ;;  %s689_s1 = inlined_call_operand.vmem [shape: s32[8], index: 1, kind: input, shape index: {}]  }
   0x1   :  { %s10_s17 = sshll.u32 %s685_s0, 4  ;;  %s15_s20 = sshll.u32 %s689_s1, 4  ;;  %s11_s17 = int_to_ptr.vmem [resolvable:$true] %s10_s17  ;;  %s16_s20 = int_to_ptr.vmem [resolvable:$true] %s15_s20 }
   0x2   :  { %13 = dma.vmem_to_smem %s11_s17, 16, %s417_s21, [#allocation2] }
   0x3   :  { %18 = dma.vmem_to_smem %s16_s20, 16, %s418_s22, [#allocation2] }
   0x4   :  { %407 = dma.done.wait [#allocation2], 32 }
   0x5   :  { %408 = vsyncadd [#allocation2], 4294967264 }
   0x6   :  { %21 = sfence }
   0x7   :  { %22 = vsyncpa [#allocation6], 0  ;;  %s28_s25 = sshll.u32 %s686_s2, 4  ;;  %s29_s25 = int_to_ptr.hbm [resolvable:$true] %s28_s25 }
   0x8   :  { %23 = vsyncpa [#allocation8], 0  ;;  %s419_s0 = smov [#allocation5]   ;;  %s41_s28 = sshll.u32 %s687_s3, 4  ;;  %s42_s28 = int_to_ptr.hbm [resolvable:$true] %s41_s28 }
   0x9   :  { %s30_s26 = sshll.u32 %s419_s0, 4  ;;  %s420_s29 = smov 512   ;;  %s31_s26 = int_to_ptr.vmem [resolvable:$true] %s30_s26 }
   0xa   :  { %s421_s30 = smov 32   ;;  %s422_s5 = smov [#allocation7]  }
   0xb   :  { %36 = dma.hbm_to_vmem [thread:$0]  %s29_s25, 16384, %s31_s26, [#allocation6], %s420_s29, %s420_s29, %s421_s30  }
   0xc   :  { %s43_s6 = sshll.u32 %s422_s5, 4  ;;  %s44_s6 = int_to_ptr.vmem [resolvable:$true] %s43_s6 }
   0xd   :  { %49 = dma.hbm_to_vmem [thread:$0]  %s42_s28, 16384, %s44_s6, [#allocation8], %s420_s29, %s420_s29, %s421_s30  }
   0xe   :  { %409 = dma.done.wait [#allocation6], 16384  }
   0xf   :  { %410 = vsyncadd [#allocation6], 4294950912 }
  0x10   :  { %411 = dma.done.wait [#allocation8], 16384  }
  0x11   :  { %412 = vsyncadd [#allocation8], 4294950912  ;;  %s462_s2 = smov 0  }
  0x12 LB: > { %s293_s3 = sshll.u32 %s415_s2, 3  ;;  %s76_s7 = sld [smem:[#allocation3]]  ;;  %v700_v20 = vmov 0  ;;  %v702_v22 = vmov 0  ;;  %v704_v24 = vmov 0  ;;  %v708_v28 = vmov 0  ;;  %s415_s2 = sphi %s462_s2, %s65_s2  }
  0x13   : > { %s470_s8 = sshra.s32 %s293_s3, 3  ;;  %s296_s9 = sld [smem:[#allocation3 + $0x1]]  ;;  %v710_v29 = vmov 0  ;;  %v712_v30 = vmov 0  ;;  %v714_v31 = vmov 0  ;;  %v717_v33 = vmov 0 }
  0x14   : > { %s312_s10 = sshll.u32 %s470_s8, 5  ;;  %s297_s11 = sld [smem:[#allocation3 + $0x2]]  ;;  %v721_v34 = vmov 0  ;;  %v725_v35 = vmov 0  ;;  %v729_v39 = vmov 0  ;;  %v732_v40 = vmov 0 }
  0x15   : > { %s71_s12 = scalar_lea.vmem [#allocation5], %s312_s10  ;;  %s298_s13 = sld [smem:[#allocation3 + $0x3]]  ;;  %v735_v42 = vmov 0  ;;  %v738_v43 = vmov 0  ;;  %v424_v44 = vmov 0  }
  0x16   : > { %v475_v0 = vld [vmem:[%s71_s12] sm:$0xff]  ;;  %v477_v3 = vld [vmem:[%s71_s12 + $0x8] sm:$0xff]  ;;  %v479_v4 = vld [vmem:[%s71_s12 + $0x10] sm:$0xff]  ;;  %s299_s14 = sld [smem:[#allocation3 + $0x4]]  ;;  %s153_s20 = scalar_lea.vmem [#allocation7], %s312_s10 }
  0x17   : > { %v481_v5 = vld [vmem:[%s71_s12 + $0x18] sm:$0xff]  ;;  %s300_s15 = sld [smem:[#allocation3 + $0x5]]  ;;  %v519_v13 = vld [vmem:[%s153_s20] sm:$0xff]  ;;  %v526_v17 = vld [vmem:[%s153_s20 + $0x8] sm:$0xff]  ;;  %s274_s27 = scalar_lea.vmem %s688_s4, %s293_s3 }
  0x18   : > { %v77_v1 = vstv %s76_s7  ;;  %s158_s16 = sld [smem:[#allocation4]]  ;;  %v535_v19 = vld [vmem:[%s153_s20 + $0x10] sm:$0xff]  ;;  %v543_v21 = vld [vmem:[%s153_s20 + $0x18] sm:$0xff]  ;;  %s65_s2 = sadd.s32 1, %s415_s2  }
  0x19   : > { %v83_v2 = vstv %s296_s9  ;;  %vm78_vm0 = vcmp.eq.s32.totalorder %v475_v0, %v77_v1  ;;  %vm79_vm2 = vcmp.eq.s32.totalorder %v477_v3, %v77_v1  ;;  %vm80_vm4 = vcmp.eq.s32.totalorder %v479_v4, %v77_v1  ;;  %s304_s17 = sld [smem:[#allocation4 + $0x1]]  ;;  %p62_p0 = scmp.ge.s32.totalorder %s65_s2, 32  }
  0x1a   : > { %vm84_vm1 = vcmp.eq.s32.totalorder %v475_v0, %v83_v2  ;;  %vm85_vm3 = vcmp.eq.s32.totalorder %v477_v3, %v83_v2  ;;  %v93_v6 = vstv %s297_s11  ;;  %vm86_vm5 = vcmp.eq.s32.totalorder %v479_v4, %v83_v2  ;;  %s305_s18 = sld [smem:[#allocation4 + $0x2]] }
  0x1b   : > { %vm81_vm6 = vcmp.eq.s32.totalorder %v481_v5, %v77_v1  ;;  %vm87_vm7 = vcmp.eq.s32.totalorder %v481_v5, %v83_v2  ;;  %vm88_vm8 = vmor %vm78_vm0, %vm84_vm1  ;;  %vm94_vm10 = vcmp.eq.s32.totalorder %v475_v0, %v93_v6  ;;  %vm95_vm12 = vcmp.eq.s32.totalorder %v477_v3, %v93_v6  ;;  %s301_s19 = sld [smem:[#allocation3 + $0x6]] }
  0x1c   : > { %vm89_vm9 = vmor %vm79_vm2, %vm85_vm3  ;;  %v103_v7 = vstv %s298_s13  ;;  %vm96_vm14 = vcmp.eq.s32.totalorder %v479_v4, %v93_v6  ;;  %vm97_vm15 = vcmp.eq.s32.totalorder %v481_v5, %v93_v6  ;;  %v113_v8 = vstv %s299_s14  ;;  %s306_s21 = sld [smem:[#allocation4 + $0x3]] }
  0x1d   : > { %vm90_vm11 = vmor %vm80_vm4, %vm86_vm5  ;;  %vm104_vm2 = vcmp.eq.s32.totalorder %v475_v0, %v103_v7  ;;  %vm105_vm4 = vcmp.eq.s32.totalorder %v477_v3, %v103_v7  ;;  %v123_v9 = vstv %s300_s15  ;;  %s307_s22 = sld [smem:[#allocation4 + $0x4]] }
  0x1e   : > { %vm91_vm13 = vmor %vm81_vm6, %vm87_vm7  ;;  %vm106_vm6 = vcmp.eq.s32.totalorder %v479_v4, %v103_v7  ;;  %vm107_vm7 = vcmp.eq.s32.totalorder %v481_v5, %v103_v7  ;;  %v159_v14 = vstv %s158_s16  ;;  %s308_s23 = sld [smem:[#allocation4 + $0x5]] }
  0x1f   : > { %vm98_vm0 = vmor %vm88_vm8, %vm94_vm10  ;;  %v165_v15 = vstv %s304_s17  ;;  %s302_s24 = sld [smem:[#allocation3 + $0x7]] }
  0x20   : > { %vm99_vm1 = vmor %vm89_vm9, %vm95_vm12  ;;  %vm114_vm9 = vcmp.eq.s32.totalorder %v475_v0, %v113_v8  ;;  %v175_v23 = vstv %s305_s18  ;;  %s309_s25 = sld [smem:[#allocation4 + $0x6]] }
  0x21   : > { %vm100_vm3 = vmor %vm90_vm11, %vm96_vm14  ;;  %vm115_vm11 = vcmp.eq.s32.totalorder %v477_v3, %v113_v8  ;;  %v133_v25 = vstv %s301_s19  ;;  %s310_s0 = sld [smem:[#allocation4 + $0x7]] }
  0x22   : > { %vm101_vm5 = vmor %vm91_vm13, %vm97_vm15  ;;  %vm116_vm13 = vcmp.eq.s32.totalorder %v479_v4, %v113_v8  ;;  %vm117_vm15 = vcmp.eq.s32.totalorder %v481_v5, %v113_v8  ;;  %v185_v27 = vstv %s306_s21 }
  0x23   : > { %vm108_vm8 = vmor %vm98_vm0, %vm104_vm2  ;;  %v195_v32 = vstv %s307_s22 }
  0x24   : > { %vm109_vm10 = vmor %vm99_vm1, %vm105_vm4  ;;  %vm124_vm1 = vcmp.eq.s32.totalorder %v475_v0, %v123_v9  ;;  %vm125_vm4 = vcmp.eq.s32.totalorder %v477_v3, %v123_v9  ;;  %v205_v36 = vstv %s308_s23 }
  0x25   : > { %vm110_vm12 = vmor %vm100_vm3, %vm106_vm6  ;;  %vm126_vm6 = vcmp.eq.s32.totalorder %v479_v4, %v123_v9  ;;  %v143_v37 = vstv %s302_s24 }
  0x26   : > { %vm111_vm14 = vmor %vm101_vm5, %vm107_vm7  ;;  %vm127_vm7 = vcmp.eq.s32.totalorder %v481_v5, %v123_v9  ;;  %v215_v38 = vstv %s309_s25 }
  0x27   : > { %vm503_vm0 = vmor %vm108_vm8, %vm114_vm9  ;;  %vm160_vm9 = vcmp.eq.s32.totalorder %v519_v13, %v159_v14  ;;  %v225_v41 = vstv %s310_s0 }
  0x28   : > { %vm507_vm2 = vmor %vm109_vm10, %vm115_vm11 }
  0x29   : > { %vm512_vm3 = vmor %vm110_vm12, %vm116_vm13  ;;  %vm166_vm12 = vcmp.eq.s32.totalorder %v519_v13, %v165_v15  ;;  %vm167_vm13 = vcmp.eq.s32.totalorder %v526_v17, %v165_v15 }
  0x2a   : > { %vm521_vm5 = vmor %vm111_vm14, %vm117_vm15  ;;  %vm161_vm14 = vcmp.eq.s32.totalorder %v526_v17, %v159_v14 }
  0x2b   : > { %vm531_vm8 = vmor %vm503_vm0, %vm124_vm1  ;;  %vm162_vm0 = vcmp.eq.s32.totalorder %v535_v19, %v159_v14  ;;  %vm163_vm1 = vcmp.eq.s32.totalorder %v543_v21, %v159_v14 }
  0x2c   : > { %vm539_vm10 = vmor %vm507_vm2, %vm125_vm4  ;;  %vm168_vm2 = vcmp.eq.s32.totalorder %v535_v19, %v165_v15 }
  0x2d   : > { %v701_v20 = vsel %vm539_vm10, 4294967295, %v700_v20  ;;  %vm549_vm11 = vmor %vm512_vm3, %vm126_vm6  ;;  %vm169_vm3 = vcmp.eq.s32.totalorder %v543_v21, %v165_v15 }
  0x2e   : > { %v703_v22 = vsel %vm549_vm11, 4294967295, %v702_v22  ;;  %vm557_vm15 = vmor %vm521_vm5, %vm127_vm7  ;;  %vm176_vm11 = vcmp.eq.s32.totalorder %v519_v13, %v175_v23  ;;  %vm177_vm5 = vcmp.eq.s32.totalorder %v526_v17, %v175_v23  ;;  %vm134_vm7 = vcmp.eq.s32.totalorder %v475_v0, %v133_v25 }
  0x2f   : > { %v705_v24 = vsel %vm557_vm15, 4294967295, %v704_v24  ;;  %vm170_vm4 = vmor %vm160_vm9, %vm166_vm12  ;;  %vm178_vm9 = vcmp.eq.s32.totalorder %v535_v19, %v175_v23  ;;  %vm135_vm12 = vcmp.eq.s32.totalorder %v477_v3, %v133_v25 }
  0x30   : > { %vm171_vm6 = vmor %vm161_vm14, %vm167_vm13  ;;  %vm179_vm14 = vcmp.eq.s32.totalorder %v543_v21, %v175_v23 }
  0x31   : > { %vm566_vm10 = vmor %vm162_vm0, %vm168_vm2  ;;  %vm136_vm0 = vcmp.eq.s32.totalorder %v479_v4, %v133_v25 }
  0x32   : > { %vm572_vm15 = vmor %vm163_vm1, %vm169_vm3  ;;  %vm186_vm1 = vcmp.eq.s32.totalorder %v519_v13, %v185_v27  ;;  %vm137_vm3 = vcmp.eq.s32.totalorder %v481_v5, %v133_v25 }
  0x33   : > { %v709_v28 = vsel %vm572_vm15, 4294967295, %v708_v28  ;;  %vm579_vm13 = vmor %vm170_vm4, %vm176_vm11  ;;  %vm187_vm4 = vcmp.eq.s32.totalorder %v526_v17, %v185_v27 }
  0x34   : > { %v711_v29 = vsel %vm579_vm13, 4294967295, %v710_v29  ;;  %vm584_vm2 = vmor %vm171_vm6, %vm177_vm5  ;;  %vm716_vm6 = vnez %v701_v20 }
  0x35   : > { %v713_v30 = vsel %vm584_vm2, 4294967295, %v712_v30  ;;  %vm592_vm15 = vmor %vm531_vm8, %vm134_vm7  ;;  %vm719_vm2 = vnez %v709_v28  ;;  %vm188_vm8 = vcmp.eq.s32.totalorder %v535_v19, %v185_v27  ;;  %vm720_vm7 = vnez %v703_v22 }
  0x36   : > { %v715_v31 = vsel %vm592_vm15, 4294967295, %v714_v31  ;;  %vm182_vm11 = vmor %vm566_vm10, %vm178_vm9  ;;  %vm189_vm10 = vcmp.eq.s32.totalorder %v543_v21, %v185_v27  ;;  %vm723_vm9 = vnez %v711_v29 }
  0x37   : > { %vm601_vm5 = vmor %vm716_vm6, %vm135_vm12  ;;  %vm724_vm12 = vnez %v705_v24 }
  0x38   : > { %v718_v33 = vsel %vm601_vm5, 4294967295, %v717_v33  ;;  %vm183_vm13 = vmor %vm719_vm2, %vm179_vm14  ;;  %vm727_vm14 = vnez %v713_v30 }
  0x39   : > { %vm610_vm15 = vmor %vm720_vm7, %vm136_vm0  ;;  %vm196_vm0 = vcmp.eq.s32.totalorder %v519_v13, %v195_v32 }
  0x3a   : > { %v722_v34 = vsel %vm610_vm15, 4294967295, %v721_v34  ;;  %vm190_vm6 = vmor %vm723_vm9, %vm186_vm1  ;;  %vm197_vm15 = vcmp.eq.s32.totalorder %v526_v17, %v195_v32  ;;  %vm198_vm9 = vcmp.eq.s32.totalorder %v535_v19, %v195_v32 }
  0x3b   : > { %vm619_vm5 = vmor %vm724_vm12, %vm137_vm3  ;;  %vm199_vm3 = vcmp.eq.s32.totalorder %v543_v21, %v195_v32 }
  0x3c   : > { %v726_v35 = vsel %vm619_vm5, 4294967295, %v725_v35  ;;  %vm191_vm2 = vmor %vm727_vm14, %vm187_vm4  ;;  %vm206_vm4 = vcmp.eq.s32.totalorder %v519_v13, %v205_v36  ;;  %vm144_vm14 = vcmp.eq.s32.totalorder %v475_v0, %v143_v37 }
  0x3d   : > { %vm192_vm7 = vmor %vm182_vm11, %vm188_vm8  ;;  %vm207_vm11 = vcmp.eq.s32.totalorder %v526_v17, %v205_v36 }
  0x3e   : > { %vm193_vm1 = vmor %vm183_vm13, %vm189_vm10  ;;  %vm145_vm10 = vcmp.eq.s32.totalorder %v477_v3, %v143_v37 }
  0x3f   : > { %vm200_vm12 = vmor %vm190_vm6, %vm196_vm0  ;;  %vm208_vm0 = vcmp.eq.s32.totalorder %v535_v19, %v205_v36  ;;  %vm146_vm6 = vcmp.eq.s32.totalorder %v479_v4, %v143_v37 }
  0x40   : > { %vm201_vm5 = vmor %vm191_vm2, %vm197_vm15  ;;  %vm209_vm2 = vcmp.eq.s32.totalorder %v543_v21, %v205_v36 }
  0x41   : > { %vm202_vm8 = vmor %vm192_vm7, %vm198_vm9  ;;  %vm147_vm7 = vcmp.eq.s32.totalorder %v481_v5, %v143_v37  ;;  %vm728_vm9 = vnez %v715_v31 }
  0x42   : > { %vm203_vm13 = vmor %vm193_vm1, %vm199_vm3 }
  0x43   : > { %vm210_vm15 = vmor %vm200_vm12, %vm206_vm4  ;;  %vm216_vm4 = vcmp.eq.s32.totalorder %v519_v13, %v215_v38  ;;  %vm731_vm12 = vnez %v718_v33 }
  0x44   : > { %vm639_vm1 = vmor %vm728_vm9, %vm144_vm14 }
  0x45   : > { %v730_v39 = vsel %vm639_vm1, 4294967295, %v729_v39  ;;  %vm211_vm3 = vmor %vm201_vm5, %vm207_vm11  ;;  %vm217_vm1 = vcmp.eq.s32.totalorder %v526_v17, %v215_v38  ;;  %vm734_vm5 = vnez %v722_v34 }
  0x46   : > { %vm646_vm9 = vmor %vm731_vm12, %vm145_vm10  ;;  %vm218_vm12 = vcmp.eq.s32.totalorder %v535_v19, %v215_v38 }
  0x47   : > { %v733_v40 = vsel %vm646_vm9, 4294967295, %v732_v40  ;;  %vm212_vm14 = vmor %vm202_vm8, %vm208_vm0  ;;  %vm737_vm9 = vnez %v726_v35  ;;  %vm219_vm8 = vcmp.eq.s32.totalorder %v543_v21, %v215_v38 }
  0x48   : > { %vm653_vm11 = vmor %vm734_vm5, %vm146_vm6 }
  0x49   : > { %v736_v42 = vsel %vm653_vm11, 4294967295, %v735_v42  ;;  %vm213_vm10 = vmor %vm203_vm13, %vm209_vm2  ;;  %vm226_vm11 = vcmp.eq.s32.totalorder %v519_v13, %v225_v41  ;;  %vm227_vm13 = vcmp.eq.s32.totalorder %v526_v17, %v225_v41 }
  0x4a   : > { %vm660_vm0 = vmor %vm737_vm9, %vm147_vm7  ;;  %vm228_vm9 = vcmp.eq.s32.totalorder %v535_v19, %v225_v41 }
  0x4b   : > { %v739_v43 = vsel %vm660_vm0, 4294967295, %v738_v43  ;;  %vm220_vm5 = vmor %vm210_vm15, %vm216_vm4  ;;  %vm229_vm0 = vcmp.eq.s32.totalorder %v543_v21, %v225_v41 }
  0x4c   : > { %vm221_vm6 = vmor %vm211_vm3, %vm217_vm1 }
  0x4d   : > { %vm222_vm2 = vmor %vm212_vm14, %vm218_vm12  ;;  %vm740_vm12 = vnez %v730_v39 }
  0x4e   : > { %vm223_vm7 = vmor %vm213_vm10, %vm219_vm8  ;;  %vm741_vm8 = vnez %v733_v40 }
  0x4f   : > { %vm230_vm4 = vmor %vm220_vm5, %vm226_vm11  ;;  %vm742_vm5 = vnez %v736_v42 }
  0x50   : > { %vm231_vm15 = vmor %vm221_vm6, %vm227_vm13  ;;  %vm743_vm6 = vnez %v739_v43 }
  0x51   : > { %vm232_vm1 = vmor %vm222_vm2, %vm228_vm9  ;;  %vm423_vm2 = vmmov 1  }
  0x52   : > { %vm233_vm3 = vmor %vm223_vm7, %vm229_vm0 }
  0x53   : > { %vm234_vm14 = vmand %vm740_vm12, %vm230_vm4 }
  0x54   : > { %vm235_vm10 = vmand %vm741_vm8, %vm231_vm15 }
  0x55   : > { %vm236_vm11 = vmand %vm742_vm5, %vm232_vm1 }
  0x56   : > { %vm237_vm13 = vmand %vm743_vm6, %vm233_vm3 }
  0x57   : > { %vm238_vm9 = vmxor %vm234_vm14, %vm423_vm2 }
  0x58   : > { %vm239_vm0 = vmxor %vm235_vm10, %vm423_vm2 }
  0x59   : > { %vm240_vm7 = vmxor %vm236_vm11, %vm423_vm2 }
  0x5a   : > { %vm241_vm4 = vmxor %vm237_vm13, %vm423_vm2 }
  0x5b   : > { %vm242_vm12 = vmpackc.low %vm238_vm9, %vm238_vm9 }
  0x5c   : > { %v243_v45 = vsel %vm242_vm12, 16711935, %v424_v44  ;;  %vm247_vm8 = vmpackc.low %vm239_vm0, %vm239_vm0 }
  0x5d   : > { %v245_v46 = vpack.c.b8 %v243_v45, %v243_v45  ;;  %v248_v47 = vsel %vm247_vm8, 16711935, %v424_v44  ;;  %vm252_vm15 = vmpackc.low %vm240_vm7, %vm240_vm7 }
  0x5e   : > { %v250_v48 = vpack.c.b8 %v248_v47, %v248_v47  ;;  %v253_v49 = vsel %vm252_vm15, 16711935, %v424_v44  ;;  %vm257_vm1 = vmpackc.low %vm241_vm4, %vm241_vm4 }
  0x5f   : > { %vm246_vm5 = vnez %v245_v46  ;;  %v255_v50 = vpack.c.b8 %v253_v49, %v253_v49  ;;  %v258_v51 = vsel %vm257_vm1, 16711935, %v424_v44 }
  0x60   : > { %vm251_vm3 = vnez %v250_v48  ;;  %v260_v52 = vpack.c.b8 %v258_v51, %v258_v51  ;;  %v262_v53 = vsel %vm246_vm5, 16843009, %v424_v44 }
  0x61   : > { %vm256_vm14 = vnez %v255_v50  ;;  %v263_v54 = vsel %vm251_vm3, 16843009, %v424_v44  ;;  %v266_v55 = vunpack.c.0.s8 %v262_v53 }
  0x62   : > { %vm261_vm10 = vnez %v260_v52  ;;  %v264_v56 = vsel %vm256_vm14, 16843009, %v424_v44  ;;  %v267_v57 = vunpack.c.0.s8 %v263_v54 }
  0x63   : > { %v265_v58 = vsel %vm261_vm10, 16843009, %v424_v44  ;;  %v268_v59 = vunpack.c.0.s8 %v264_v56 }
  0x64   : > { %v269_v60 = vunpack.c.0.s8 %v265_v58  ;;  %v270_v61 = vpack.c.b16 %v267_v57, %v266_v55 }
  0x66   : > { %v271_v62 = vpack.c.b16 %v269_v60, %v268_v59  ;;  %64 = sbr.rel (!%p62_p0) target bundleno = 18 (0x12), region = 46 }
  0x68   : > { %v272_v63 = vpack.c.b8 %v271_v62, %v270_v61 }
  0x6a   : > { %275 = vst [vmem:[%s274_s27] sm:$0xff] %v272_v63 }
  0x6b   :  { %280 = vsyncpa [#allocation6], 1 }
  0x6c   :  { %281 = vsyncpa [#allocation8], 1 }

</bundles_post_ra>
